<compile_context>
chip_gen: v7x
topology: tpu7x:2x2x1
jax: 0.10.0
libtpu: 0.0.40
codegen_flags: <defaults>
</compile_context>

<pallas_src>
import functools

import numpy as np
import jax
import jax.numpy as jnp
from jax.experimental import pallas as pl
from jax.experimental.pallas import tpu as pltpu


def _bicubic_weight_matrix(in_size: int, out_size: int, a: float = -0.75) -> np.ndarray:
    """(out_size, in_size) interpolation matrix matching torch bicubic
    (align_corners=False, antialias=False, A=-0.75), with border clamping."""
    scale = in_size / out_size
    i = np.arange(out_size, dtype=np.float64)
    x = (i + 0.5) * scale - 0.5
    x0 = np.floor(x)
    t = x - x0

    def cubic(z):
        z = np.abs(z)
        z2, z3 = z * z, z * z * z
        f1 = (a + 2.0) * z3 - (a + 3.0) * z2 + 1.0
        f2 = a * z3 - 5.0 * a * z2 + 8.0 * a * z - 4.0 * a
        return np.where(z <= 1.0, f1, np.where(z < 2.0, f2, 0.0))

    W = np.zeros((out_size, in_size), dtype=np.float64)
    rows = np.arange(out_size)
    for off in (-1, 0, 1, 2):
        idx = np.clip(x0 + off, 0, in_size - 1).astype(np.int64)
        w = cubic(t - off)
        np.add.at(W, (rows, idx), w)
    return W


def _build_weights(H, W, new_h, new_w, max_size, dtype):
    """Pad-baked weight matrices.

    a_h_pad : (max_size, H)   rows    >= new_h are zero (bottom pad baked in)
    a_wT_pad: (W, max_size)   columns >= new_w are zero (right pad baked in)
    """
    a_h = _bicubic_weight_matrix(H, new_h)                 # (new_h, H)
    a_w = _bicubic_weight_matrix(W, new_w)                 # (new_w, W)
    a_h_pad = np.zeros((max_size, H), dtype=np.float64)
    a_h_pad[:new_h, :] = a_h
    a_wT_pad = np.zeros((W, max_size), dtype=np.float64)
    a_wT_pad[:, :new_w] = a_w.T
    return jnp.asarray(a_h_pad, dtype=dtype), jnp.asarray(a_wT_pad, dtype=dtype)


def _mxu_tile() -> int:
    """MXU tile edge for the matmul-order heuristic (256 on v6e/v7x)."""
    try:
        info = pltpu.get_tpu_info()
    except Exception:
        return 256
    for name in ("mxu_contracting_size", "mxu_column_count", "mxu_size"):
        v = getattr(info, name, None)
        if isinstance(v, int) and v > 0:
            return v
    return 256


def _vmem_capacity_bytes() -> int:
    try:
        cap = pltpu.get_tpu_info().vmem_capacity_bytes
        if cap:
            return int(cap)
    except Exception:
        pass
    return 128 * 2 ** 20


def _resize_pad_kernel(x_ref, ah_ref, awt_ref, o_ref, *,
                       new_h, new_w, max_size, fill, rows_first, compute_dtype):
    # x_ref: (1, H, W) one channel; ah_ref: (max_size, H); awt_ref: (W, max_size)
    # o_ref: (1, max_size, max_size)
    x = x_ref[0].astype(compute_dtype)       # in-kernel cast (handles uint8/f32 inputs)
    ah = ah_ref[...]                          # bottom pad = zero rows
    awt = awt_ref[...]                        # right pad  = zero columns

    if rows_first:
        tmp = jnp.dot(ah, x, preferred_element_type=jnp.float32)           # (max_size, W)
        res = jnp.dot(tmp.astype(compute_dtype), awt,
                      preferred_element_type=jnp.float32)                  # (max_size, max_size)
    else:
        tmp = jnp.dot(x, awt, preferred_element_type=jnp.float32)          # (H, max_size)
        res = jnp.dot(ah, tmp.astype(compute_dtype),
                      preferred_element_type=jnp.float32)                  # (max_size, max_size)

    # Pad rows/cols are exact zeros (baked into the weights).  Non-zero fill is
    # injected with one cheap 2-D VPU select instead of extra stores.
    if fill != 0.0 and (new_h < max_size or new_w < max_size):
        row = jax.lax.broadcasted_iota(jnp.int32, res.shape, 0)
        col = jax.lax.broadcasted_iota(jnp.int32, res.shape, 1)
        res = jnp.where((row < new_h) & (col < new_w), res, jnp.float32(fill))

    # Bicubic overshoot must clamp (not wrap) for integer image dtypes.
    if jnp.issubdtype(o_ref.dtype, jnp.integer):
        ii = jnp.iinfo(o_ref.dtype)
        res = jnp.clip(jnp.round(res), ii.min, ii.max)

    # Single unmasked, lane-dense full-tile store.
    o_ref[...] = res[None].astype(o_ref.dtype)


def resize_longest(img: jnp.ndarray, max_size: int, fill: float = 0.0,
                   *, use_bf16: bool = True) -> jnp.ndarray:
    """img: (C, H, W) array. Returns (C, max_size, max_size) in img.dtype.

    Pass the image in its narrowest storage dtype (e.g. uint8); the cast to the
    bf16/f32 compute dtype happens inside the kernel so the HBM read stays
    minimal.  The output keeps the input dtype.
    """
    C, H, W = img.shape
    scale = max_size / float(max(H, W))
    new_h, new_w = int(round(H * scale)), int(round(W * scale))

    compute_dtype = jnp.bfloat16 if use_bf16 else jnp.float32
    a_h, a_wT = _build_weights(H, W, new_h, new_w, max_size, compute_dtype)

    # Matmul-order heuristic on MXU-tile-padded dims (what actually drives the
    # number of vmatmul passes), not raw MAC counts.
    t = _mxu_tile()
    pad = lambda d: -(-d // t) * t
    Hp, Wp, Sp = pad(H), pad(W), pad(max_size)
    rows_first_cost = Sp * Hp * Wp + Sp * Wp * Sp     # (S,H)@(H,W) then (S,W)@(W,S)
    cols_first_cost = Hp * Wp * Sp + Sp * Hp * Sp     # (H,W)@(W,S) then (S,H)@(H,S)
    rows_first = rows_first_cost <= cols_first_cost

    kernel = functools.partial(
        _resize_pad_kernel, new_h=new_h, new_w=new_w, max_size=max_size,
        fill=float(fill), rows_first=rows_first, compute_dtype=compute_dtype)

    # VMEM budget: double-buffered image/output blocks, single-buffered weights,
    # f32 intermediates, 1.5x headroom; cap at 75% of physical VMEM capacity.
    x_item = jnp.dtype(img.dtype).itemsize
    w_item = jnp.dtype(compute_dtype).itemsize
    vmem_est = (2 * H * W * x_item
                + (max_size * H + W * max_size) * w_item
                + 2 * max_size * max_size * x_item
                + 4 * (max_size * max(H, W) + 2 * max_size * max_size))
    vmem_budget = int(0.75 * _vmem_capacity_bytes())
    vmem_limit = int(min(max(1.5 * vmem_est, 32 * 2 ** 20), vmem_budget))

    def _call(weight_pipeline_mode):
        wkw = ({} if weight_pipeline_mode is None
               else {"pipeline_mode": weight_pipeline_mode})
        return pl.pallas_call(
            kernel,
            out_shape=jax.ShapeDtypeStruct((C, max_size, max_size), img.dtype),
            grid=(C,),
            in_specs=[
                pl.BlockSpec((1, H, W), lambda c: (c, 0, 0)),
                pl.BlockSpec((max_size, H), lambda c: (0, 0), **wkw),
                pl.BlockSpec((W, max_size), lambda c: (0, 0), **wkw),
            ],
            out_specs=pl.BlockSpec((1, max_size, max_size), lambda c: (c, 0, 0)),
            compiler_params=pltpu.CompilerParams(
                dimension_semantics=("parallel",),
                vmem_limit_bytes=vmem_limit),
        )(img, a_h, a_wT)

    try:
        # Weight blocks are constant across the grid — single-buffer them.
        return _call(pl.Buffered(1))
    except Exception:
        # Fall back to default (double) buffering if Buffered(1) is rejected.
        return _call(None)


def _reference(img, max_size, fill=0.0):
    """Plain-JAX reference: separable bicubic resize then right/bottom pad."""
    C, H, W = img.shape
    scale = max_size / float(max(H, W))
    new_h, new_w = int(round(H * scale)), int(round(W * scale))
    a_h = jnp.asarray(_bicubic_weight_matrix(H, new_h), jnp.float32)
    a_w = jnp.asarray(_bicubic_weight_matrix(W, new_w), jnp.float32)
    res = jnp.einsum('ph,chw,qw->cpq', a_h, img.astype(jnp.float32), a_w,
                     precision=jax.lax.Precision.HIGHEST)
    if jnp.issubdtype(img.dtype, jnp.integer):
        ii = jnp.iinfo(img.dtype)
        res = jnp.clip(jnp.round(res), ii.min, ii.max)
    out = jnp.full((C, max_size, max_size), fill, dtype=img.dtype)
    return out.at[:, :new_h, :new_w].set(res.astype(img.dtype))


if __name__ == "__main__":
    key = jax.random.PRNGKey(0)
    keys = jax.random.split(key, 5)

    # (C, H, W, max_size, fill, use_bf16, atol)
    cases = [
        (3, 16, 12, 24, 0.0, False, 1e-5),   # f32 path, H longest, zero fill
        (3, 16, 12, 24, 2.0, True, 6e-2),    # bf16 default, right pad + non-zero fill
        (3, 12, 16, 24, 1.5, True, 6e-2),    # bf16, W longest, bottom pad rows
        (3, 8, 12, 24, 0.5, True, 6e-2),     # upscale; exercises matmul-order heuristic
    ]

    for k, (C, H, W, MAX_SIZE, FILL, BF16, ATOL) in zip(keys, cases):
        img = jax.random.uniform(k, (C, H, W), dtype=jnp.float32)

        out = jax.block_until_ready(resize_longest(img, MAX_SIZE, FILL, use_bf16=BF16))
        ref = jax.block_until_ready(_reference(img, MAX_SIZE, FILL))

        assert out.shape == (C, MAX_SIZE, MAX_SIZE), out.shape
        np.testing.assert_allclose(np.asarray(out), np.asarray(ref),
                                   rtol=0.0, atol=ATOL)

    # uint8 input: narrow-dtype caller contract + integer round/clamp on store.
    img_u8 = (jax.random.uniform(keys[4], (3, 12, 16)) * 255.0).astype(jnp.uint8)
    out_u8 = jax.block_until_ready(resize_longest(img_u8, 24, 0, use_bf16=False))
    ref_u8 = jax.block_until_ready(_reference(img_u8, 24, 0))
    assert out_u8.shape == (3, 24, 24) and out_u8.dtype == jnp.uint8
    np.testing.assert_allclose(np.asarray(out_u8, np.float32),
                               np.asarray(ref_u8, np.float32), rtol=0.0, atol=1.01)

    print("KERNEL_OK")
</pallas_src>

<mosaic_0001>
module attributes {stable_mosaic.version = 11 : i64} {
  func.func @_resize_pad_kernel(%arg0: i32, %arg1: memref<1x16x12xf32, #tpu.memory_space<vmem>>, %arg2: memref<24x16xf32, #tpu.memory_space<vmem>>, %arg3: memref<12x24xf32, #tpu.memory_space<vmem>>, %arg4: memref<1x24x24xf32, #tpu.memory_space<vmem>>) attributes {dimension_semantics = [#tpu.dimension_semantics<parallel>], iteration_bounds = array<i64: 3>, scalar_prefetch = 0 : i64, scratch_operands = 0 : i64, tpu.core_type = #tpu.core_type<tc>, window_params = [{transform_indices = @transform_0, window_bounds = array<i64: 1, 16, 12>}, {pipeline_mode = #tpu.pipeline_mode<synchronous>, transform_indices = @transform_1, window_bounds = array<i64: 24, 16>}, {pipeline_mode = #tpu.pipeline_mode<synchronous>, transform_indices = @transform_2, window_bounds = array<i64: 12, 24>}, {transform_indices = @transform_3, window_bounds = array<i64: 1, 24, 24>}]} {
    %c0 = arith.constant 0 : index
    %c0_0 = arith.constant 0 : index
    %c0_1 = arith.constant 0 : index
    %0 = vector.load %arg1[%c0, %c0_0, %c0_1] : memref<1x16x12xf32, #tpu.memory_space<vmem>>, vector<1x16x12xf32>
    %1 = vector.shape_cast %0 : vector<1x16x12xf32> to vector<16x12xf32>
    %c0_2 = arith.constant 0 : index
    %c0_3 = arith.constant 0 : index
    %2 = vector.load %arg2[%c0_2, %c0_3] : memref<24x16xf32, #tpu.memory_space<vmem>>, vector<24x16xf32>
    %c0_4 = arith.constant 0 : index
    %c0_5 = arith.constant 0 : index
    %3 = vector.load %arg3[%c0_4, %c0_5] : memref<12x24xf32, #tpu.memory_space<vmem>>, vector<12x24xf32>
    %cst = arith.constant dense<0.000000e+00> : vector<24x12xf32>
    %4 = tpu.matmul %2, %1, %cst {dimension_numbers = #tpu.dot_dimension_numbers<[1], [0], [0], [1], [0, 0, 1, 1], [], []>} : vector<24x16xf32>, vector<16x12xf32>, vector<24x12xf32> -> vector<24x12xf32>
    %cst_6 = arith.constant dense<0.000000e+00> : vector<24x24xf32>
    %5 = tpu.matmul %4, %3, %cst_6 {dimension_numbers = #tpu.dot_dimension_numbers<[1], [0], [0], [1], [0, 0, 1, 1], [], []>} : vector<24x12xf32>, vector<12x24xf32>, vector<24x24xf32> -> vector<24x24xf32>
    %6 = vector.shape_cast %5 : vector<24x24xf32> to vector<1x24x24xf32>
    %c0_7 = arith.constant 0 : index
    %c0_8 = arith.constant 0 : index
    %c0_9 = arith.constant 0 : index
    %7 = vector.load %arg4[%c0_7, %c0_8, %c0_9] : memref<1x24x24xf32, #tpu.memory_space<vmem>>, vector<1x24x24xf32>
    tpu.vector_store %arg4[%c0_7, %c0_8, %c0_9], %6 {strides = array<i32>} : memref<1x24x24xf32, #tpu.memory_space<vmem>>, vector<1x24x24xf32>,
    return
  }
  func.func @transform_0(%arg0: i32) -> (i32, i32, i32) {
    %c0_i32 = arith.constant 0 : i32
    %c0_i32_0 = arith.constant 0 : i32
    %c0_i32_1 = arith.constant 0 : i32
    return %arg0, %c0_i32, %c0_i32_0 : i32, i32, i32
  }
  func.func @transform_1(%arg0: i32) -> (i32, i32) {
    %c0_i32 = arith.constant 0 : i32
    %c0_i32_0 = arith.constant 0 : i32
    %c0_i32_1 = arith.constant 0 : i32
    return %c0_i32, %c0_i32_0 : i32, i32
  }
  func.func @transform_2(%arg0: i32) -> (i32, i32) {
    %c0_i32 = arith.constant 0 : i32
    %c0_i32_0 = arith.constant 0 : i32
    %c0_i32_1 = arith.constant 0 : i32
    return %c0_i32, %c0_i32_0 : i32, i32
  }
  func.func @transform_3(%arg0: i32) -> (i32, i32, i32) {
    %c0_i32 = arith.constant 0 : i32
    %c0_i32_0 = arith.constant 0 : i32
    %c0_i32_1 = arith.constant 0 : i32
    return %arg0, %c0_i32, %c0_i32_0 : i32, i32, i32
  }
}

module attributes {stable_mosaic.version = 11 : i64} {
  func.func @_resize_pad_kernel(%arg0: i32, %arg1: memref<1x16x12xf32, #tpu.memory_space<vmem>>, %arg2: memref<24x16xf32, #tpu.memory_space<vmem>>, %arg3: memref<12x24xf32, #tpu.memory_space<vmem>>, %arg4: memref<1x24x24xf32, #tpu.memory_space<vmem>>) attributes {dimension_semantics = [#tpu.dimension_semantics<parallel>], iteration_bounds = array<i64: 3>, scalar_prefetch = 0 : i64, scratch_operands = 0 : i64, tpu.core_type = #tpu.core_type<tc>, window_params = [{transform_indices = @transform_0, window_bounds = array<i64: 1, 16, 12>}, {pipeline_mode = #tpu.pipeline_mode<synchronous>, transform_indices = @transform_1, window_bounds = array<i64: 24, 16>}, {pipeline_mode = #tpu.pipeline_mode<synchronous>, transform_indices = @transform_2, window_bounds = array<i64: 12, 24>}, {transform_indices = @transform_3, window_bounds = array<i64: 1, 24, 24>}]} {
    %c0 = arith.constant 0 : index
    %c0_0 = arith.constant 0 : index
    %c0_1 = arith.constant 0 : index
    %0 = vector.load %arg1[%c0, %c0_0, %c0_1] : memref<1x16x12xf32, #tpu.memory_space<vmem>>, vector<1x16x12xf32>
    %1 = vector.shape_cast %0 : vector<1x16x12xf32> to vector<16x12xf32>
    %c0_2 = arith.constant 0 : index
    %c0_3 = arith.constant 0 : index
    %2 = vector.load %arg2[%c0_2, %c0_3] : memref<24x16xf32, #tpu.memory_space<vmem>>, vector<24x16xf32>
    %c0_4 = arith.constant 0 : index
    %c0_5 = arith.constant 0 : index
    %3 = vector.load %arg3[%c0_4, %c0_5] : memref<12x24xf32, #tpu.memory_space<vmem>>, vector<12x24xf32>
    %cst = arith.constant dense<0.000000e+00> : vector<24x12xf32>
    %4 = tpu.matmul %2, %1, %cst {dimension_numbers = #tpu.dot_dimension_numbers<[1], [0], [0], [1], [0, 0, 1, 1], [], []>} : vector<24x16xf32>, vector<16x12xf32>, vector<24x12xf32> -> vector<24x12xf32>
    %cst_6 = arith.constant dense<0.000000e+00> : vector<24x24xf32>
    %5 = tpu.matmul %4, %3, %cst_6 {dimension_numbers = #tpu.dot_dimension_numbers<[1], [0], [0], [1], [0, 0, 1, 1], [], []>} : vector<24x12xf32>, vector<12x24xf32>, vector<24x24xf32> -> vector<24x24xf32>
    %6 = vector.shape_cast %5 : vector<24x24xf32> to vector<1x24x24xf32>
    %c0_7 = arith.constant 0 : index
    %c0_8 = arith.constant 0 : index
    %c0_9 = arith.constant 0 : index
    %7 = vector.load %arg4[%c0_7, %c0_8, %c0_9] : memref<1x24x24xf32, #tpu.memory_space<vmem>>, vector<1x24x24xf32>
    tpu.vector_store %arg4[%c0_7, %c0_8, %c0_9], %6 {strides = array<i32>} : memref<1x24x24xf32, #tpu.memory_space<vmem>>, vector<1x24x24xf32>,
    return
  }
  func.func @transform_0(%arg0: i32) -> (i32, i32, i32) {
    %c0_i32 = arith.constant 0 : i32
    %c0_i32_0 = arith.constant 0 : i32
    %c0_i32_1 = arith.constant 0 : i32
    return %arg0, %c0_i32, %c0_i32_0 : i32, i32, i32
  }
  func.func @transform_1(%arg0: i32) -> (i32, i32) {
    %c0_i32 = arith.constant 0 : i32
    %c0_i32_0 = arith.constant 0 : i32
    %c0_i32_1 = arith.constant 0 : i32
    return %c0_i32, %c0_i32_0 : i32, i32
  }
  func.func @transform_2(%arg0: i32) -> (i32, i32) {
    %c0_i32 = arith.constant 0 : i32
    %c0_i32_0 = arith.constant 0 : i32
    %c0_i32_1 = arith.constant 0 : i32
    return %c0_i32, %c0_i32_0 : i32, i32
  }
  func.func @transform_3(%arg0: i32) -> (i32, i32, i32) {
    %c0_i32 = arith.constant 0 : i32
    %c0_i32_0 = arith.constant 0 : i32
    %c0_i32_1 = arith.constant 0 : i32
    return %arg0, %c0_i32, %c0_i32_0 : i32, i32, i32
  }
}

</mosaic_0001>

<bundles_post_ra>
// kernel: tpu_custom_call.1
= control target key start
LH: loop header
LB: loop body
LE: loop exit
PB: predicated region body
PF: predicated region fallthrough
CT: control target
= control target key end

     0   :  { %8 = vsyncpa [#allocation3], 0  ;;  %s899_s0 = inlined_call_operand.hbm [shape: f32[3,16,12], index: 0, kind: input, shape index: {}]   ;;  %s900_s1 = inlined_call_operand.vmem [shape: f32[24,16], index: 1, kind: input, shape index: {}]   ;;  %s901_s2 = inlined_call_operand.vmem [shape: f32[12,24], index: 2, kind: input, shape index: {}]   ;;  %s902_s3 = inlined_call_operand.hbm [shape: f32[3,24,24], index: 3, kind: output, shape index: {}]  }
   0x1   :  { %10 = vsyncpa [#allocation3 + $0x1], 0 }
   0x2   :  { %11 = vsyncpa [#allocation4], 0 }
   0x3   :  { %13 = vsyncpa [#allocation4 + $0x1], 0  ;;  %s717_s12 = smov 0   ;;  %s719_s13 = smov 0  }
   0x4   :  { %s721_s14 = smov 0   ;;  %s723_s15 = smov 0  }
   0x5 LB: > { %s738_s16 = sadd.s32 4294967295, %s685_s15   ;;  %s471_s17 = sadd.s32 4294967294, %s685_s15   ;;  %s685_s15 = sphi %s723_s15, %s914_s15   ;;  %s681_s14 = sphi %s721_s14, %s913_s14   ;;  %s677_s13 = sphi %s719_s13, %s912_s13   ;;  %s673_s12 = sphi %s717_s12, %s911_s12  }
   0x6   : > { %s742_s18 = sadd.s32 1, %s685_s15   ;;  %s26_s19 = sadd.s32 1, %s681_s14 }
   0x7   : > { %s23_s20 = ssub.s32 %s685_s15, %s742_s18  ;;  %p33_p0 = scmp.ne.s32.totalorder %s681_s14, %s677_s13 }
   0x8   : > { %p24_p1 = scmp.eq.s32.totalorder %s23_s20, 0  ;;  %p34_p2 = scmp.eq.s32.totalorder %s685_s15, 0 }
   0x9   : > { %p39_p3 = scmp.ne.s32.totalorder %s677_s13, %s673_s12  ;;  %p40_p4 = scmp.eq.s32.totalorder %s738_s16, 0 }
   0xa   : > { %s754_s21 = scalar_select %p24_p1, %s681_s14, %s26_s19  }
   0xb   : > { %p756_p5 = por %p34_p2, %p33_p0  ;;  %p760_p6 = por %p40_p4, %p39_p3 }
   0xc   : > { %p105_p7 = scmp.eq.s32.totalorder %s738_s16, 2  ;;  %p111_p8 = scmp.eq.s32.totalorder %s471_s17, 2 }
   0xd   : > { %p547_p9 = scmp.lt.s32.totalorder %s685_s15, 3  ;;  %s137_s26 = sand.u32 1, %s681_s14  }
   0xe   : > { %p766_p10 = por %p105_p7, %p33_p0  ;;  %p770_p11 = por %p111_p8, %p39_p3 }
   0xf   : > { %s489_s27 = sshll.u32 %s685_s15, 8  ;;  %s474_s28 = sshll.u32 %s137_s26, 4 }
  0x10   : > { %s906_s24 = scalar_select %p766_p10, 1, 0 }
  0x11   : > { %s907_s25 = scalar_select %p770_p11, 1, 0 }
  0x12   : > { %s779_s4 = scalar_lea.hbm %s899_s0, %s489_s27  ;;  %s141_s5 = scalar_lea.vmem [#allocation2], %s474_s28 }
  0x13   : > { %s148_s6 = sshll.u32 %s141_s5, 4  ;;  %p783_p12 = pnand %p547_p9, %p756_p5  ;;  %s787_s6 = int_to_ptr.vmem [resolvable:$true] %s148_s6 }
  0x14   : > { %s789_s8 = scalar_lea.sflag [#allocation3], %s137_s26  ;;  %s589_s9 = scalar_lea.hbm %s779_s4, 256 }
  0x15   : > { %p590_p13 = scmp.ne.s32.totalorder %s779_s4, %s589_s9  ;;  %p591_p0 = pneg %p783_p12 }
  0x16   : > { %s594_s17 = scalar_lea.hbm %s899_s0, 768  ;;  %p595_p3 = scmp.lt.u32.totalorder %s779_s4, %s899_s0 }
  0x17   : > { %p592_p1 = pnand %p591_p0, %p590_p13  ;;  %p596_p4 = scmp.lt.u32.totalorder %s594_s17, %s589_s9 }
  0x18   : > { %p598_p7 = scmp.lt.u32.totalorder %s589_s9, %s779_s4 }
  0x19   : > { %p593_p2 = pneg %p592_p1  ;;  %p597_p5 = por %p596_p4, %p595_p3 }
  0x1b   : > { %p599_p8 = por %p598_p7, %p597_p5 }
  0x1d   : > { %p600_p9 = pnand %p599_p8, %p593_p2 }
  0x1f   : > { %603 = shalt.err (!%p600_p9)
}
  0x20   : > { %s604_s22 = scalar_lea.vmem %s787_s6, 256  ;;  %s687_s26 = smov [#allocation2]  }
  0x21   : > { %p605_p13 = scmp.ne.s32.totalorder %s787_s6, %s604_s22  ;;  %s609_s27 = sshll.u32 %s687_s26, 4  ;;  %s610_s27 = int_to_ptr.vmem [resolvable:$false] %s609_s27 }
  0x22   : > { %s611_s28 = scalar_lea.vmem %s610_s27, 512  ;;  %p612_p10 = scmp.lt.s32.totalorder %s787_s6, %s610_s27 }
  0x23   : > { %p607_p1 = pnand %p605_p13, %p591_p0  ;;  %p613_p3 = scmp.lt.s32.totalorder %s611_s28, %s604_s22 }
  0x25   : > { %p608_p11 = pneg %p607_p1  ;;  %p614_p4 = por %p613_p3, %p612_p10 }
  0x27   : > { %p615_p5 = pnand %p614_p4, %p608_p11 }
  0x29   : > { %618 = shalt.err (!%p615_p5)
}
  0x2a   : > { %s688_s29 = smov 128   ;;  %s689_s30 = smov 8  }
  0x2b   : > { %542 = dma.hbm_to_vmem [thread:$0]  (!%p783_p12), %s779_s4, 256, %s787_s6, %s789_s8, %s688_s29, %s688_s29, %s689_s30  }
  0x2c   : > { %p477_p0 = scmp.ge.s32.totalorder %s685_s15, 1  ;;  %p156_p2 = scmp.lt.s32.totalorder %s685_s15, 4 }
  0x2e   : > { %p157_p7 = pnand %p477_p0, %p156_p2 }
  0x2f   : > { %s820_s5 = sand.u32 (!%p157_p7), 1, %s677_s13  }
  0x30   : > { %160 = sbr.rel (%p157_p7) target bundleno = 510 (0x1fe), region = 32  ;;  %s478_s9 = sshll.u32 (!%p157_p7), %s820_s5, 4 }
  0x31   : > { %s163_s10 = scalar_lea.sflag (!%p157_p7), [#allocation3], %s820_s5  ;;  %s166_s11 = scalar_lea.vmem (!%p157_p7), [#allocation2], %s478_s9 }
  0x37   : > { %664 = dma.done.wait (%p760_p6), %s163_s10, 256  }
  0x38   : > { %666 = vsyncadd (%p760_p6), %s163_s10, 4294967040  ;;  %v690_v0 = vmov 0.0|0.0   ;;  %vm691_vm0 = vmmov 0   ;;  %v692_v1 = vmov 0.0   ;;  %vm296_vm1 = vcmask 1043456   ;;  %v189_v2 = vld [vmem:[%s166_s11] sm:$0xff] }
  0x39   : > { %526 = vmatprep.subr.bf16.mxu0 %v690_v0  ;;  %504 = vmatprep.mubr.msk.f32.mxu0 %vm691_vm0, %v692_v1  ;;  %v190_v3 = vld [vmem:[%s166_s11 + $0x8] sm:$0xff]  ;;  %v194_v5 = vld [vmem:[%s901_s2] sm:$0xff]  ;;  %vm693_vm2 = vmmov 1   ;;  %vm196_vm4 = vcmask 130048   ;;  %v193_v10 = vld [vmem:[%s900_s1 + $0x10] sm:$0xff]  ;;  %vm286_vm5 = vcmask 97280  }
  0x3a   : > { %529 = vmatprep.subr.bf16.mxu1 %v690_v0  ;;  %517 = vmatprep.mubr.msk.f32.mxu1 %vm691_vm0, %v692_v1  ;;  %v527_v4 = vpack.c.bf16 %v190_v3, %v189_v2  ;;  %v195_v6 = vld [vmem:[%s901_s2 + $0x8] sm:$0xf]  ;;  %vm531_vm3 = vmpackc.low %vm296_vm1, %vm693_vm2  ;;  %v191_v7 = vld [vmem:[%s900_s1] sm:$0xff]  ;;  %s533_s27 = smul.u32 24, %s820_s5  ;;  %vm380_vm6 = vcmask 195584   ;;  %s385_s4 = scalar_lea.sflag [#allocation4], %s820_s5 }
  0x3b   : > { %v530_v8 = vpack.c.bf16 %v195_v6, %v194_v5  ;;  %v192_v9 = vld [vmem:[%s900_s1 + $0x8] sm:$0xff]  ;;  %s534_s30 = smul.u32 384, %s738_s16  ;;  %p909_p10 = scmp.ne.s32.totalorder %s906_s24, 0 }
  0x3c   : > { %528 = vmatpush3.bf16.msra.mxu0 %v527_v4  ;;  %s188_s28 = scalar_lea.vmem [#allocation5], %s533_s27  ;;  %s694_s16 = smov [#allocation5]  }
  0x3d   : > { %532 = vmatpush3.bf16.msk.msra.mxu1 %vm531_vm3, %v530_v8  ;;  %s398_s29 = sshll.u32 %s188_s28, 4  ;;  %s856_s11 = scalar_lea.hbm %s902_s3, %s534_s30  ;;  %s851_s29 = int_to_ptr.vmem [resolvable:$true] %s398_s29 }
  0x3e   : > { %s619_s6 = scalar_lea.vmem %s851_s29, 384  ;;  %s623_s7 = sshll.u32 %s694_s16, 4  ;;  %s624_s7 = int_to_ptr.vmem [resolvable:$false] %s623_s7 }
  0x3f   : > { %505 = vmatmul.mubr.msk.f32.vlgmr.msra.gmra.mrb[0].mxu0 %vm196_vm4, %v191_v7  ;;  %p620_p6 = scmp.ne.s32.totalorder %s851_s29, %s619_s6  ;;  %s625_s23 = scalar_lea.vmem %s624_s7, 768 }
  0x40   : > { %507 = vmatprep.mubr.msk.f32.mxu0 %vm691_vm0, %v692_v1  ;;  %p626_p8 = scmp.lt.s32.totalorder %s851_s29, %s624_s7  ;;  %p627_p9 = scmp.lt.s32.totalorder %s625_s23, %s619_s6 }
  0x41   : > { %p621_p11 = pnand %p620_p6, %p909_p10 }
  0x42   : > { %p628_p13 = por %p627_p9, %p626_p8 }
  0x43   : > { %508 = vmatmul.mubr.msk.f32.gmra.mrb[2].mxu0 %vm196_vm4, %v192_v9  ;;  %p622_p12 = pneg %p621_p11 }
  0x44   : > { %510 = vmatprep.mubr.msk.f32.mxu0 %vm691_vm0, %v692_v1 }
  0x45   : > { %p629_p1 = pnand %p628_p13, %p622_p12 }
  0x47   : > { %511 = vmatmul.mubr.msk.f32.gmra.mrb[4].mxu0 %vm196_vm4, %v193_v10 }
 0x112   : > { %v272_v11 = vpop.f32.mrb[0].mxu0 }
 0x113   : > { %v506_v12 = vpop.f32.mrb[1].mxu0  ;;  %518 = vmatmul.mubr.msk.f32.vlgmr.msra.gmra.mrb[0].mxu1 %vm286_vm5, %v272_v11 }
 0x114   : > { %520 = vmatprep.mubr.msk.f32.mxu1 %vm691_vm0, %v692_v1 }
 0x116   : > { %v277_v13 = vpop.f32.mrb[2].mxu0 }
 0x117   : > { %v509_v14 = vpop.f32.mrb[3].mxu0  ;;  %521 = vmatmul.mubr.msk.f32.gmra.mrb[2].mxu1 %vm286_vm5, %v277_v13 }
 0x118   : > { %523 = vmatprep.mubr.msk.f32.mxu1 %vm691_vm0, %v692_v1 }
 0x11a   : > { %v282_v15 = vpop.f32.mrb[4].mxu0 }
 0x11b   : > { %v512_v16 = vpop.f32.mrb[5].mxu0  ;;  %524 = vmatmul.mubr.msk.f32.gmra.mrb[4].mxu1 %vm286_vm5, %v282_v15 }
 0x1e6   : > { %v366_v17 = vpop.f32.mrb[0].mxu1 }
 0x1e7   : > { %381 = vst.msk [vmem:[%s188_s28] sm:$0xff] %vm380_vm6, %v366_v17  ;;  %v519_v18 = vpop.f32.mrb[1].mxu1 }
 0x1ea   : > { %v371_v19 = vpop.f32.mrb[2].mxu1 }
 0x1eb   : > { %382 = vst.msk [vmem:[%s188_s28 + $0x8] sm:$0xff] %vm380_vm6, %v371_v19  ;;  %v522_v20 = vpop.f32.mrb[3].mxu1 }
 0x1ee   : > { %v376_v21 = vpop.f32.mrb[4].mxu1 }
 0x1ef   : > { %383 = vst.msk [vmem:[%s188_s28 + $0x10] sm:$0xff] %vm380_vm6, %v376_v21  ;;  %v525_v22 = vpop.f32.mrb[5].mxu1 }
 0x1f0   : > { %632 = shalt.err (!%p629_p1)
}
 0x1f1   : > { %s633_s8 = scalar_lea.hbm %s856_s11, 384  ;;  %s637_s20 = scalar_lea.hbm %s902_s3, 1152 }
 0x1f2   : > { %p634_p3 = scmp.ne.s32.totalorder %s856_s11, %s633_s8  ;;  %p638_p0 = scmp.lt.u32.totalorder %s856_s11, %s902_s3 }
 0x1f3   : > { %p639_p2 = scmp.lt.u32.totalorder %s637_s20, %s633_s8  ;;  %p641_p6 = scmp.lt.u32.totalorder %s633_s8, %s856_s11 }
 0x1f4   : > { %p635_p4 = pnand %p634_p3, %p909_p10 }
 0x1f5   : > { %p640_p7 = por %p639_p2, %p638_p0 }
 0x1f6   : > { %p636_p5 = pneg %p635_p4 }
 0x1f7   : > { %p642_p11 = por %p641_p6, %p640_p7 }
 0x1f9   : > { %p643_p12 = pnand %p642_p11, %p636_p5 }
 0x1fb   : > { %646 = shalt.err (!%p643_p12)
}
 0x1fc   : > { %s695_s27 = smov 128   ;;  %s696_s28 = smov 8  }
 0x1fd   : > { %537 = dma.vmem_to_hbm [thread:$0]  (%p909_p10), %s851_s29, 384, %s856_s11, %s385_s4, %s695_s27, %s695_s27, %s696_s28  }
 0x1fe PF: > { %p548_p8 = scmp.ge.s32.totalorder %s685_s15, 2  ;;  %s413_s30 = sand.u32 1, %s673_s12  }
 0x1ff   : > { %p910_p9 = scmp.ne.s32.totalorder %s907_s25, 0  ;;  %s414_s9 = scalar_lea.sflag [#allocation4], %s413_s30 }
 0x201   : > { %p544_p13 = pnand %p548_p8, %p910_p9 }
 0x203   : > { %668 = dma.done.wait (!%p544_p13), %s414_s9, 384  }
 0x204   : > { %670 = vsyncadd (!%p544_p13), %s414_s9, 4294966912  ;;  %p16_p1 = scmp.ge.s32.totalorder %s742_s18, 5   ;;  %s911_s12 = smov %s677_s13 }
 0x205   : > { %s912_s13 = smov %s681_s14  ;;  %s913_s14 = smov %s754_s21 }
 0x206   : > { %s914_s15 = smov %s742_s18  ;;  %18 = sbr.rel (!%p16_p1) target bundleno = 5 (0x5), region = 77 }
 0x20d   :  { %419 = vsyncpa [#allocation3], 1 }
 0x20e   :  { %421 = vsyncpa [#allocation3 + $0x1], 1 }
 0x20f   :  { %422 = vsyncpa [#allocation4], 1 }
 0x210   :  { %424 = vsyncpa [#allocation4 + $0x1], 1 }

// kernel: tpu_custom_call.1
= control target key start
LH: loop header
LB: loop body
LE: loop exit
PB: predicated region body
PF: predicated region fallthrough
CT: control target
= control target key end

     0   :  { %8 = vsyncpa [#allocation3], 0  ;;  %s899_s0 = inlined_call_operand.hbm [shape: f32[3,16,12], index: 0, kind: input, shape index: {}]   ;;  %s900_s1 = inlined_call_operand.vmem [shape: f32[24,16], index: 1, kind: input, shape index: {}]   ;;  %s901_s2 = inlined_call_operand.vmem [shape: f32[12,24], index: 2, kind: input, shape index: {}]   ;;  %s902_s3 = inlined_call_operand.hbm [shape: f32[3,24,24], index: 3, kind: output, shape index: {}]  }
   0x1   :  { %10 = vsyncpa [#allocation3 + $0x1], 0 }
   0x2   :  { %11 = vsyncpa [#allocation4], 0 }
   0x3   :  { %13 = vsyncpa [#allocation4 + $0x1], 0  ;;  %s717_s12 = smov 0   ;;  %s719_s13 = smov 0  }
   0x4   :  { %s721_s14 = smov 0   ;;  %s723_s15 = smov 0  }
   0x5 LB: > { %s738_s16 = sadd.s32 4294967295, %s685_s15   ;;  %s471_s17 = sadd.s32 4294967294, %s685_s15   ;;  %s685_s15 = sphi %s723_s15, %s914_s15   ;;  %s681_s14 = sphi %s721_s14, %s913_s14   ;;  %s677_s13 = sphi %s719_s13, %s912_s13   ;;  %s673_s12 = sphi %s717_s12, %s911_s12  }
   0x6   : > { %s742_s18 = sadd.s32 1, %s685_s15   ;;  %s26_s19 = sadd.s32 1, %s681_s14 }
   0x7   : > { %s23_s20 = ssub.s32 %s685_s15, %s742_s18  ;;  %p33_p0 = scmp.ne.s32.totalorder %s681_s14, %s677_s13 }
   0x8   : > { %p24_p1 = scmp.eq.s32.totalorder %s23_s20, 0  ;;  %p34_p2 = scmp.eq.s32.totalorder %s685_s15, 0 }
   0x9   : > { %p39_p3 = scmp.ne.s32.totalorder %s677_s13, %s673_s12  ;;  %p40_p4 = scmp.eq.s32.totalorder %s738_s16, 0 }
   0xa   : > { %s754_s21 = scalar_select %p24_p1, %s681_s14, %s26_s19  }
   0xb   : > { %p756_p5 = por %p34_p2, %p33_p0  ;;  %p760_p6 = por %p40_p4, %p39_p3 }
   0xc   : > { %p105_p7 = scmp.eq.s32.totalorder %s738_s16, 2  ;;  %p111_p8 = scmp.eq.s32.totalorder %s471_s17, 2 }
   0xd   : > { %p547_p9 = scmp.lt.s32.totalorder %s685_s15, 3  ;;  %s137_s26 = sand.u32 1, %s681_s14  }
   0xe   : > { %p766_p10 = por %p105_p7, %p33_p0  ;;  %p770_p11 = por %p111_p8, %p39_p3 }
   0xf   : > { %s489_s27 = sshll.u32 %s685_s15, 8  ;;  %s474_s28 = sshll.u32 %s137_s26, 4 }
  0x10   : > { %s906_s24 = scalar_select %p766_p10, 1, 0 }
  0x11   : > { %s907_s25 = scalar_select %p770_p11, 1, 0 }
  0x12   : > { %s779_s4 = scalar_lea.hbm %s899_s0, %s489_s27  ;;  %s141_s5 = scalar_lea.vmem [#allocation2], %s474_s28 }
  0x13   : > { %s148_s6 = sshll.u32 %s141_s5, 4  ;;  %p783_p12 = pnand %p547_p9, %p756_p5  ;;  %s787_s6 = int_to_ptr.vmem [resolvable:$true] %s148_s6 }
  0x14   : > { %s789_s8 = scalar_lea.sflag [#allocation3], %s137_s26  ;;  %s589_s9 = scalar_lea.hbm %s779_s4, 256 }
  0x15   : > { %p590_p13 = scmp.ne.s32.totalorder %s779_s4, %s589_s9  ;;  %p591_p0 = pneg %p783_p12 }
  0x16   : > { %s594_s17 = scalar_lea.hbm %s899_s0, 768  ;;  %p595_p3 = scmp.lt.u32.totalorder %s779_s4, %s899_s0 }
  0x17   : > { %p592_p1 = pnand %p591_p0, %p590_p13  ;;  %p596_p4 = scmp.lt.u32.totalorder %s594_s17, %s589_s9 }
  0x18   : > { %p598_p7 = scmp.lt.u32.totalorder %s589_s9, %s779_s4 }
  0x19   : > { %p593_p2 = pneg %p592_p1  ;;  %p597_p5 = por %p596_p4, %p595_p3 }
  0x1b   : > { %p599_p8 = por %p598_p7, %p597_p5 }
  0x1d   : > { %p600_p9 = pnand %p599_p8, %p593_p2 }
  0x1f   : > { %603 = shalt.err (!%p600_p9)
}
  0x20   : > { %s604_s22 = scalar_lea.vmem %s787_s6, 256  ;;  %s687_s26 = smov [#allocation2]  }
  0x21   : > { %p605_p13 = scmp.ne.s32.totalorder %s787_s6, %s604_s22  ;;  %s609_s27 = sshll.u32 %s687_s26, 4  ;;  %s610_s27 = int_to_ptr.vmem [resolvable:$false] %s609_s27 }
  0x22   : > { %s611_s28 = scalar_lea.vmem %s610_s27, 512  ;;  %p612_p10 = scmp.lt.s32.totalorder %s787_s6, %s610_s27 }
  0x23   : > { %p607_p1 = pnand %p605_p13, %p591_p0  ;;  %p613_p3 = scmp.lt.s32.totalorder %s611_s28, %s604_s22 }
  0x25   : > { %p608_p11 = pneg %p607_p1  ;;  %p614_p4 = por %p613_p3, %p612_p10 }
  0x27   : > { %p615_p5 = pnand %p614_p4, %p608_p11 }
  0x29   : > { %618 = shalt.err (!%p615_p5)
}
  0x2a   : > { %s688_s29 = smov 128   ;;  %s689_s30 = smov 8  }
  0x2b   : > { %542 = dma.hbm_to_vmem [thread:$0]  (!%p783_p12), %s779_s4, 256, %s787_s6, %s789_s8, %s688_s29, %s688_s29, %s689_s30  }
  0x2c   : > { %p477_p0 = scmp.ge.s32.totalorder %s685_s15, 1  ;;  %p156_p2 = scmp.lt.s32.totalorder %s685_s15, 4 }
  0x2e   : > { %p157_p7 = pnand %p477_p0, %p156_p2 }
  0x2f   : > { %s820_s5 = sand.u32 (!%p157_p7), 1, %s677_s13  }
  0x30   : > { %160 = sbr.rel (%p157_p7) target bundleno = 510 (0x1fe), region = 32  ;;  %s478_s9 = sshll.u32 (!%p157_p7), %s820_s5, 4 }
  0x31   : > { %s163_s10 = scalar_lea.sflag (!%p157_p7), [#allocation3], %s820_s5  ;;  %s166_s11 = scalar_lea.vmem (!%p157_p7), [#allocation2], %s478_s9 }
  0x37   : > { %664 = dma.done.wait (%p760_p6), %s163_s10, 256  }
  0x38   : > { %666 = vsyncadd (%p760_p6), %s163_s10, 4294967040  ;;  %v690_v0 = vmov 0.0|0.0   ;;  %vm691_vm0 = vmmov 0   ;;  %v692_v1 = vmov 0.0   ;;  %vm296_vm1 = vcmask 1043456   ;;  %v189_v2 = vld [vmem:[%s166_s11] sm:$0xff] }
  0x39   : > { %526 = vmatprep.subr.bf16.mxu0 %v690_v0  ;;  %504 = vmatprep.mubr.msk.f32.mxu0 %vm691_vm0, %v692_v1  ;;  %v190_v3 = vld [vmem:[%s166_s11 + $0x8] sm:$0xff]  ;;  %v194_v5 = vld [vmem:[%s901_s2] sm:$0xff]  ;;  %vm693_vm2 = vmmov 1   ;;  %vm196_vm4 = vcmask 130048   ;;  %v193_v10 = vld [vmem:[%s900_s1 + $0x10] sm:$0xff]  ;;  %vm286_vm5 = vcmask 97280  }
  0x3a   : > { %529 = vmatprep.subr.bf16.mxu1 %v690_v0  ;;  %517 = vmatprep.mubr.msk.f32.mxu1 %vm691_vm0, %v692_v1  ;;  %v527_v4 = vpack.c.bf16 %v190_v3, %v189_v2  ;;  %v195_v6 = vld [vmem:[%s901_s2 + $0x8] sm:$0xf]  ;;  %vm531_vm3 = vmpackc.low %vm296_vm1, %vm693_vm2  ;;  %v191_v7 = vld [vmem:[%s900_s1] sm:$0xff]  ;;  %s533_s27 = smul.u32 24, %s820_s5  ;;  %vm380_vm6 = vcmask 195584   ;;  %s385_s4 = scalar_lea.sflag [#allocation4], %s820_s5 }
  0x3b   : > { %v530_v8 = vpack.c.bf16 %v195_v6, %v194_v5  ;;  %v192_v9 = vld [vmem:[%s900_s1 + $0x8] sm:$0xff]  ;;  %s534_s30 = smul.u32 384, %s738_s16  ;;  %p909_p10 = scmp.ne.s32.totalorder %s906_s24, 0 }
  0x3c   : > { %528 = vmatpush3.bf16.msra.mxu0 %v527_v4  ;;  %s188_s28 = scalar_lea.vmem [#allocation5], %s533_s27  ;;  %s694_s16 = smov [#allocation5]  }
  0x3d   : > { %532 = vmatpush3.bf16.msk.msra.mxu1 %vm531_vm3, %v530_v8  ;;  %s398_s29 = sshll.u32 %s188_s28, 4  ;;  %s856_s11 = scalar_lea.hbm %s902_s3, %s534_s30  ;;  %s851_s29 = int_to_ptr.vmem [resolvable:$true] %s398_s29 }
  0x3e   : > { %s619_s6 = scalar_lea.vmem %s851_s29, 384  ;;  %s623_s7 = sshll.u32 %s694_s16, 4  ;;  %s624_s7 = int_to_ptr.vmem [resolvable:$false] %s623_s7 }
  0x3f   : > { %505 = vmatmul.mubr.msk.f32.vlgmr.msra.gmra.mrb[0].mxu0 %vm196_vm4, %v191_v7  ;;  %p620_p6 = scmp.ne.s32.totalorder %s851_s29, %s619_s6  ;;  %s625_s23 = scalar_lea.vmem %s624_s7, 768 }
  0x40   : > { %507 = vmatprep.mubr.msk.f32.mxu0 %vm691_vm0, %v692_v1  ;;  %p626_p8 = scmp.lt.s32.totalorder %s851_s29, %s624_s7  ;;  %p627_p9 = scmp.lt.s32.totalorder %s625_s23, %s619_s6 }
  0x41   : > { %p621_p11 = pnand %p620_p6, %p909_p10 }
  0x42   : > { %p628_p13 = por %p627_p9, %p626_p8 }
  0x43   : > { %508 = vmatmul.mubr.msk.f32.gmra.mrb[2].mxu0 %vm196_vm4, %v192_v9  ;;  %p622_p12 = pneg %p621_p11 }
  0x44   : > { %510 = vmatprep.mubr.msk.f32.mxu0 %vm691_vm0, %v692_v1 }
  0x45   : > { %p629_p1 = pnand %p628_p13, %p622_p12 }
  0x47   : > { %511 = vmatmul.mubr.msk.f32.gmra.mrb[4].mxu0 %vm196_vm4, %v193_v10 }
 0x112   : > { %v272_v11 = vpop.f32.mrb[0].mxu0 }
 0x113   : > { %v506_v12 = vpop.f32.mrb[1].mxu0  ;;  %518 = vmatmul.mubr.msk.f32.vlgmr.msra.gmra.mrb[0].mxu1 %vm286_vm5, %v272_v11 }
 0x114   : > { %520 = vmatprep.mubr.msk.f32.mxu1 %vm691_vm0, %v692_v1 }
 0x116   : > { %v277_v13 = vpop.f32.mrb[2].mxu0 }
 0x117   : > { %v509_v14 = vpop.f32.mrb[3].mxu0  ;;  %521 = vmatmul.mubr.msk.f32.gmra.mrb[2].mxu1 %vm286_vm5, %v277_v13 }
 0x118   : > { %523 = vmatprep.mubr.msk.f32.mxu1 %vm691_vm0, %v692_v1 }
 0x11a   : > { %v282_v15 = vpop.f32.mrb[4].mxu0 }
 0x11b   : > { %v512_v16 = vpop.f32.mrb[5].mxu0  ;;  %524 = vmatmul.mubr.msk.f32.gmra.mrb[4].mxu1 %vm286_vm5, %v282_v15 }
 0x1e6   : > { %v366_v17 = vpop.f32.mrb[0].mxu1 }
 0x1e7   : > { %381 = vst.msk [vmem:[%s188_s28] sm:$0xff] %vm380_vm6, %v366_v17  ;;  %v519_v18 = vpop.f32.mrb[1].mxu1 }
 0x1ea   : > { %v371_v19 = vpop.f32.mrb[2].mxu1 }
 0x1eb   : > { %382 = vst.msk [vmem:[%s188_s28 + $0x8] sm:$0xff] %vm380_vm6, %v371_v19  ;;  %v522_v20 = vpop.f32.mrb[3].mxu1 }
 0x1ee   : > { %v376_v21 = vpop.f32.mrb[4].mxu1 }
 0x1ef   : > { %383 = vst.msk [vmem:[%s188_s28 + $0x10] sm:$0xff] %vm380_vm6, %v376_v21  ;;  %v525_v22 = vpop.f32.mrb[5].mxu1 }
 0x1f0   : > { %632 = shalt.err (!%p629_p1)
}
 0x1f1   : > { %s633_s8 = scalar_lea.hbm %s856_s11, 384  ;;  %s637_s20 = scalar_lea.hbm %s902_s3, 1152 }
 0x1f2   : > { %p634_p3 = scmp.ne.s32.totalorder %s856_s11, %s633_s8  ;;  %p638_p0 = scmp.lt.u32.totalorder %s856_s11, %s902_s3 }
 0x1f3   : > { %p639_p2 = scmp.lt.u32.totalorder %s637_s20, %s633_s8  ;;  %p641_p6 = scmp.lt.u32.totalorder %s633_s8, %s856_s11 }
 0x1f4   : > { %p635_p4 = pnand %p634_p3, %p909_p10 }
 0x1f5   : > { %p640_p7 = por %p639_p2, %p638_p0 }
 0x1f6   : > { %p636_p5 = pneg %p635_p4 }
 0x1f7   : > { %p642_p11 = por %p641_p6, %p640_p7 }
 0x1f9   : > { %p643_p12 = pnand %p642_p11, %p636_p5 }
 0x1fb   : > { %646 = shalt.err (!%p643_p12)
}
 0x1fc   : > { %s695_s27 = smov 128   ;;  %s696_s28 = smov 8  }
 0x1fd   : > { %537 = dma.vmem_to_hbm [thread:$0]  (%p909_p10), %s851_s29, 384, %s856_s11, %s385_s4, %s695_s27, %s695_s27, %s696_s28  }
 0x1fe PF: > { %p548_p8 = scmp.ge.s32.totalorder %s685_s15, 2  ;;  %s413_s30 = sand.u32 1, %s673_s12  }
 0x1ff   : > { %p910_p9 = scmp.ne.s32.totalorder %s907_s25, 0  ;;  %s414_s9 = scalar_lea.sflag [#allocation4], %s413_s30 }
 0x201   : > { %p544_p13 = pnand %p548_p8, %p910_p9 }
 0x203   : > { %668 = dma.done.wait (!%p544_p13), %s414_s9, 384  }
 0x204   : > { %670 = vsyncadd (!%p544_p13), %s414_s9, 4294966912  ;;  %p16_p1 = scmp.ge.s32.totalorder %s742_s18, 5   ;;  %s911_s12 = smov %s677_s13 }
 0x205   : > { %s912_s13 = smov %s681_s14  ;;  %s913_s14 = smov %s754_s21 }
 0x206   : > { %s914_s15 = smov %s742_s18  ;;  %18 = sbr.rel (!%p16_p1) target bundleno = 5 (0x5), region = 77 }
 0x20d   :  { %419 = vsyncpa [#allocation3], 1 }
 0x20e   :  { %421 = vsyncpa [#allocation3 + $0x1], 1 }
 0x20f   :  { %422 = vsyncpa [#allocation4], 1 }
 0x210   :  { %424 = vsyncpa [#allocation4 + $0x1], 1 }

</bundles_post_ra>
